<compile_context>
chip_gen: v6e
topology: v6e:2x2x1
jax: 0.10.0
libtpu: 0.0.40
codegen_flags: <defaults>
</compile_context>

<pallas_src>
import jax
import jax.numpy as jnp
from jax.experimental import pallas as pl
from jax.experimental.pallas import tpu as pltpu


_LANE = 128      # lane width (last dim)
_SUBLANE = 8     # f32 sublane height (second-to-last dim)


def _round_up(n, m):
    return ((n + m - 1) // m) * m


def _pad2(a, rows, cols):
    r, c = a.shape
    if r == rows and c == cols:
        return a
    return jnp.pad(a, ((0, rows - r), (0, cols - c)))


# -----------------------------------------------------------------------------
# Kernel bodies
# -----------------------------------------------------------------------------
def _fused_whole_kernel(x_ref, w_ref, b_ref, y_ref, p_ref):
    """Single-shot path: everything resident in VMEM, no grid/pipelining."""
    y = jnp.dot(x_ref[...], w_ref[...], preferred_element_type=jnp.float32)
    y = y + b_ref[...]                                   # bias broadcast over sublanes
    y_ref[...] = y.astype(y_ref.dtype)                   # forward() output
    p_ref[...] = jax.nn.sigmoid(y).astype(p_ref.dtype)   # predict() output (EUP)


def _fused_tiled_kernel(x_ref, w_ref, b_ref, y_ref, p_ref, acc_ref):
    """Tiled path: (M, N, K) grid, f32 accumulator, epilogue on last K step."""
    k = pl.program_id(2)

    @pl.when(k == 0)
    def _():
        acc_ref[...] = jnp.zeros_like(acc_ref)

    acc_ref[...] += jnp.dot(x_ref[...], w_ref[...],
                            preferred_element_type=jnp.float32)

    @pl.when(k == pl.num_programs(2) - 1)
    def _():
        y = acc_ref[...] + b_ref[...]
        y_ref[...] = y.astype(y_ref.dtype)
        p_ref[...] = jax.nn.sigmoid(y).astype(p_ref.dtype)


# -----------------------------------------------------------------------------
# Wrappers
# -----------------------------------------------------------------------------
def _fused_whole_call(x, w, b):
    B, K = x.shape
    N = w.shape[1]
    Bp = _round_up(B, _SUBLANE)
    Kp = _round_up(K, _LANE)
    Np = _round_up(N, _LANE)

    xp = _pad2(x, Bp, Kp)
    wp = _pad2(w, Kp, Np)
    bp = _pad2(b.reshape(1, -1), 1, Np)

    y, p = pl.pallas_call(
        _fused_whole_kernel,
        out_shape=(jax.ShapeDtypeStruct((Bp, Np), x.dtype),
                   jax.ShapeDtypeStruct((Bp, Np), x.dtype)),
        in_specs=[pl.BlockSpec(memory_space=pltpu.MemorySpace.VMEM)] * 3,
        out_specs=(pl.BlockSpec(memory_space=pltpu.MemorySpace.VMEM),
                   pl.BlockSpec(memory_space=pltpu.MemorySpace.VMEM)),
    )(xp, wp, bp)
    return y[:B, :N], p[:B, :N]


def _fused_tiled_call(x, w, b, *, tm=128, tn=128, tk=128):
    B, K = x.shape
    N = w.shape[1]
    Bp = _round_up(B, tm)
    Kp = _round_up(K, tk)
    Np = _round_up(N, tn)

    xp = _pad2(x, Bp, Kp)
    wp = _pad2(w, Kp, Np)
    bp = _pad2(b.reshape(1, -1), 1, Np)

    grid = (Bp // tm, Np // tn, Kp // tk)
    y, p = pl.pallas_call(
        _fused_tiled_kernel,
        out_shape=(jax.ShapeDtypeStruct((Bp, Np), x.dtype),
                   jax.ShapeDtypeStruct((Bp, Np), x.dtype)),
        grid_spec=pltpu.PrefetchScalarGridSpec(
            num_scalar_prefetch=0,
            grid=grid,
            in_specs=[
                pl.BlockSpec((tm, tk), lambda i, j, k: (i, k)),
                pl.BlockSpec((tk, tn), lambda i, j, k: (k, j)),   # W indep. of batch axis
                pl.BlockSpec((1, tn), lambda i, j, k: (0, j)),
            ],
            out_specs=[
                pl.BlockSpec((tm, tn), lambda i, j, k: (i, j)),
                pl.BlockSpec((tm, tn), lambda i, j, k: (i, j)),
            ],
            scratch_shapes=[pltpu.VMEM((tm, tn), jnp.float32)],
        ),
        compiler_params=pltpu.CompilerParams(
            dimension_semantics=("parallel", "parallel", "arbitrary"),
        ),
    )(xp, wp, bp)
    return y[:B, :N], p[:B, :N]


def pred_sigmoid_forward_and_predict(x, w, b):
    """Fused (forward, predict) of _PredSigmoidNet with net = Linear(W, b)."""
    B, K = x.shape
    N = w.shape[1]
    Bp = _round_up(B, _SUBLANE)
    Kp = _round_up(K, _LANE)
    Np = _round_up(N, _LANE)
    itemsize = jnp.dtype(x.dtype).itemsize
    footprint = (Bp * Kp + Kp * Np + Np + 2 * Bp * Np) * itemsize
    if footprint <= 4 * 1024 * 1024:       # fits comfortably in scoped VMEM everywhere
        return _fused_whole_call(x, w, b)
    return _fused_tiled_call(x, w, b)


def pred_sigmoid_forward(x, w, b):
    """Equivalent of _PredSigmoidNet.forward: x @ W + b."""
    return pred_sigmoid_forward_and_predict(x, w, b)[0]


def pred_sigmoid_predict(x, w, b):
    """Equivalent of _PredSigmoidNet.predict: sigmoid(x @ W + b)."""
    return pred_sigmoid_forward_and_predict(x, w, b)[1]


if __name__ == "__main__":
    key = jax.random.PRNGKey(0)
    kx, kw, kb = jax.random.split(key, 3)

    # Small shapes consistent with a Linear(32 -> 16) wrapped by _PredSigmoidNet.
    B, Fin, Fout = 8, 32, 16
    x = jax.random.normal(kx, (B, Fin), dtype=jnp.float32)
    bound = 1.0 / jnp.sqrt(jnp.float32(Fin))   # mirrors nn.Linear init range
    w = jax.random.uniform(kw, (Fin, Fout), jnp.float32, -bound, bound)
    b = jax.random.uniform(kb, (1, Fout), jnp.float32, -bound, bound)

    y_fwd, y_pred = pred_sigmoid_forward_and_predict(x, w, b)
    y_fwd, y_pred = jax.block_until_ready((y_fwd, y_pred))

    ref = x @ w + b
    assert jnp.allclose(y_fwd, ref, atol=1e-5, rtol=1e-5)
    assert jnp.allclose(y_pred, jax.nn.sigmoid(ref), atol=1e-5, rtol=1e-5)

    # Also exercise the tiled path once (still modest shapes) to verify the
    # scalable design: (M, N, K) grid, accumulator, fused bias+sigmoid epilogue.
    B2, K2, N2 = 256, 384, 256
    x2 = jax.random.normal(kx, (B2, K2), dtype=jnp.float32)
    w2 = jax.random.uniform(kw, (K2, N2), jnp.float32, -0.05, 0.05)
    b2 = jax.random.uniform(kb, (1, N2), jnp.float32, -0.05, 0.05)
    y2, p2 = _fused_tiled_call(x2, w2, b2)
    y2, p2 = jax.block_until_ready((y2, p2))
    ref2 = x2 @ w2 + b2
    assert jnp.allclose(y2, ref2, atol=1e-4, rtol=1e-4)
    assert jnp.allclose(p2, jax.nn.sigmoid(ref2), atol=1e-5, rtol=1e-4)

    print("KERNEL_OK")
</pallas_src>

<mosaic_0001>
module attributes {stable_mosaic.version = 11 : i64} {
  func.func @_fused_whole_kernel(%arg0: memref<8x128xf32, #tpu.memory_space<vmem>>, %arg1: memref<128x128xf32, #tpu.memory_space<vmem>>, %arg2: memref<1x128xf32, #tpu.memory_space<vmem>>, %arg3: memref<8x128xf32, #tpu.memory_space<vmem>>, %arg4: memref<8x128xf32, #tpu.memory_space<vmem>>) attributes {dimension_semantics = [], scalar_prefetch = 0 : i64, scratch_operands = 0 : i64, tpu.core_type = #tpu.core_type<tc>} {
    %c0 = arith.constant 0 : index
    %c0_0 = arith.constant 0 : index
    %0 = vector.load %arg0[%c0, %c0_0] : memref<8x128xf32, #tpu.memory_space<vmem>>, vector<8x128xf32>
    %c0_1 = arith.constant 0 : index
    %c0_2 = arith.constant 0 : index
    %1 = vector.load %arg1[%c0_1, %c0_2] : memref<128x128xf32, #tpu.memory_space<vmem>>, vector<128x128xf32>
    %cst = arith.constant dense<0.000000e+00> : vector<8x128xf32>
    %2 = tpu.matmul %0, %1, %cst {dimension_numbers = #tpu.dot_dimension_numbers<[1], [0], [0], [1], [0, 0, 1, 1], [], []>} : vector<8x128xf32>, vector<128x128xf32>, vector<8x128xf32> -> vector<8x128xf32>
    %c0_3 = arith.constant 0 : index
    %c0_4 = arith.constant 0 : index
    %3 = vector.load %arg2[%c0_3, %c0_4] : memref<1x128xf32, #tpu.memory_space<vmem>>, vector<1x128xf32>
    %4 = vector.broadcast %3 : vector<1x128xf32> to vector<8x128xf32>
    %5 = arith.addf %2, %4 : vector<8x128xf32>
    %c0_5 = arith.constant 0 : index
    %c0_6 = arith.constant 0 : index
    %6 = vector.load %arg3[%c0_5, %c0_6] : memref<8x128xf32, #tpu.memory_space<vmem>>, vector<8x128xf32>
    tpu.vector_store %arg3[%c0_5, %c0_6], %5 {strides = array<i32>} : memref<8x128xf32, #tpu.memory_space<vmem>>, vector<8x128xf32>,
    %7 = arith.negf %5 : vector<8x128xf32>
    %8 = math.exp %7 : vector<8x128xf32>
    %cst_7 = arith.constant 1.000000e+00 : f32
    %9 = vector.broadcast %cst_7 : f32 to vector<8x128xf32>
    %10 = arith.addf %9, %8 : vector<8x128xf32>
    %11 = arith.divf %9, %10 : vector<8x128xf32>
    %c0_8 = arith.constant 0 : index
    %c0_9 = arith.constant 0 : index
    %12 = vector.load %arg4[%c0_8, %c0_9] : memref<8x128xf32, #tpu.memory_space<vmem>>, vector<8x128xf32>
    tpu.vector_store %arg4[%c0_8, %c0_9], %11 {strides = array<i32>} : memref<8x128xf32, #tpu.memory_space<vmem>>, vector<8x128xf32>,
    return
  }
}

</mosaic_0001>

<bundles_post_ra>
// kernel: tpu_custom_call.1
= control target key start
LH: loop header
LB: loop body
LE: loop exit
PB: predicated region body
PF: predicated region fallthrough
CT: control target
= control target key end

     0   :  { %10 = vsyncpa [#allocation3], 0  ;;  %s378_s0 = inlined_call_operand.hbm [shape: f32[8,128], index: 0, kind: input, shape index: {}]   ;;  %s379_s1 = inlined_call_operand.hbm [shape: f32[128,128], index: 1, kind: input, shape index: {}]   ;;  %s380_s2 = inlined_call_operand.vmem [shape: f32[1,128], index: 2, kind: input, shape index: {}]   ;;  %s381_s3 = inlined_call_operand.hbm [shape: f32[8,128], index: 3, kind: output, shape index: {0}]   ;;  %s382_s4 = inlined_call_operand.hbm [shape: f32[8,128], index: 4, kind: output, shape index: {1}]  }
   0x1   :  { %11 = vsyncpa [#allocation6], 0 }
   0x2   :  { %12 = vsyncpa [#allocation4], 0 }
   0x3   :  { %13 = vsyncpa [#allocation9], 0  ;;  %s330_s15 = smov [#allocation2]   ;;  %s331_s17 = smov [#allocation5]  }
   0x4   :  { %s20_s16 = sshll.u32 %s330_s15, 4  ;;  %s29_s18 = sshll.u32 %s331_s17, 4  ;;  %s21_s16 = int_to_ptr.vmem [resolvable:$true] %s20_s16  ;;  %s30_s18 = int_to_ptr.vmem [resolvable:$true] %s29_s18 }
   0x5   :  { %s250_s19 = scalar_lea.vmem %s21_s16, 128  ;;  %p255_p1 = scmp.lt.s32.totalorder %s21_s16, %s21_s16 }
   0x6   :  { %p251_p0 = scmp.ne.s32.totalorder %s21_s16, %s250_s19  ;;  %p256_p2 = scmp.lt.s32.totalorder %s250_s19, %s250_s19 }
   0x8   :  { %p257_p3 = por %p256_p2, %p255_p1 }
   0xa   :  { %p258_p4 = pnand %p257_p3, %p251_p0 }
   0xc   :  { %261 = shalt.err (!%p258_p4)
}
   0xd   :  { %23 = dma.hbm_to_vmem [thread:$0]  %s378_s0, 128, %s21_s16, [#allocation3]  }
   0xe   :  { %s270_s22 = scalar_lea.vmem %s30_s18, 2048  ;;  %p275_p6 = scmp.lt.s32.totalorder %s30_s18, %s30_s18 }
   0xf   :  { %p271_p5 = scmp.ne.s32.totalorder %s30_s18, %s270_s22  ;;  %p276_p7 = scmp.lt.s32.totalorder %s270_s22, %s270_s22 }
  0x11   :  { %p277_p8 = por %p276_p7, %p275_p6 }
  0x13   :  { %p278_p9 = pnand %p277_p8, %p271_p5 }
  0x15   :  { %281 = shalt.err (!%p278_p9)
}
  0x16   :  { %s332_s23 = smov 128   ;;  %s333_s24 = smov 8  }
  0x17   :  { %35 = dma.hbm_to_vmem [thread:$0]  %s379_s1, 2048, %s30_s18, [#allocation6], %s332_s23, %s332_s23, %s333_s24  }
  0x18   :  { %322 = dma.done.wait [#allocation3], 128  }
  0x19   :  { %323 = vsyncadd [#allocation3], 4294967168 }
  0x1a   :  { %324 = dma.done.wait [#allocation6], 2048  }
  0x1b   :  { %325 = vsyncadd [#allocation6], 4294965248  ;;  %v334_v0 = vmov 0.0   ;;  %vm335_vm0 = vmmov 0   ;;  %v60_v1 = vld [vmem:[#allocation5 + $0x78] sm:$0xff]  ;;  %v59_v2 = vld [vmem:[#allocation5 + $0x70] sm:$0xff] }
  0x1c   :  { %195 = vmatprep.subr.mxu0 %v334_v0  ;;  %227 = vmatprep.mubr.msk.f32.mxu0 %vm335_vm0, %v334_v0  ;;  %v58_v3 = vld [vmem:[#allocation5 + $0x68] sm:$0xff]  ;;  %v57_v4 = vld [vmem:[#allocation5 + $0x60] sm:$0xff]  ;;  %v56_v5 = vld [vmem:[#allocation5 + $0x58] sm:$0xff]  ;;  %s336_s27 = smov [#allocation7]  }
  0x1d   :  { %196 = vmatpush3.msra.mxu0 %v60_v1  ;;  %v55_v6 = vld [vmem:[#allocation5 + $0x50] sm:$0xff]  ;;  %v54_v7 = vld [vmem:[#allocation5 + $0x48] sm:$0xff]  ;;  %v53_v8 = vld [vmem:[#allocation5 + $0x40] sm:$0xff]  ;;  %s152_s28 = sshll.u32 %s336_s27, 4  ;;  %s153_s28 = int_to_ptr.vmem [resolvable:$true] %s152_s28 }
  0x1e   :  { %197 = vmatprep.subr.mxu0 %v334_v0  ;;  %v52_v9 = vld [vmem:[#allocation5 + $0x38] sm:$0xff]  ;;  %v51_v10 = vld [vmem:[#allocation5 + $0x30] sm:$0xff]  ;;  %v50_v11 = vld [vmem:[#allocation5 + $0x28] sm:$0xff]  ;;  %s282_s29 = scalar_lea.vmem %s153_s28, 128  ;;  %p287_p11 = scmp.lt.s32.totalorder %s153_s28, %s153_s28 }
  0x1f   :  { %198 = vmatpush3.msra.mxu0 %v59_v2  ;;  %v49_v12 = vld [vmem:[#allocation5 + $0x20] sm:$0xff]  ;;  %v48_v13 = vld [vmem:[#allocation5 + $0x18] sm:$0xff]  ;;  %v47_v14 = vld [vmem:[#allocation5 + $0x10] sm:$0xff]  ;;  %p283_p10 = scmp.ne.s32.totalorder %s153_s28, %s282_s29  ;;  %p288_p12 = scmp.lt.s32.totalorder %s282_s29, %s282_s29 }
  0x20   :  { %199 = vmatprep.subr.mxu0 %v334_v0  ;;  %v46_v15 = vld [vmem:[#allocation5 + $0x8] sm:$0xff]  ;;  %v45_v16 = vld [vmem:[#allocation5] sm:$0xff]  ;;  %v44_v17 = vld [vmem:[#allocation2] sm:$0xff] }
  0x21   :  { %200 = vmatpush3.msra.mxu0 %v58_v3  ;;  %v176_v18 = vld [vmem:[%s380_s2] ss:$0 sm:$0xff]  ;;  %p289_p13 = por %p288_p12, %p287_p11 }
  0x22   :  { %201 = vmatprep.subr.mxu0 %v334_v0 }
  0x23   :  { %202 = vmatpush3.msra.mxu0 %v57_v4  ;;  %p290_p0 = pnand %p289_p13, %p283_p10 }
  0x24   :  { %203 = vmatprep.subr.mxu0 %v334_v0 }
  0x25   :  { %204 = vmatpush3.msra.mxu0 %v56_v5 }
  0x26   :  { %205 = vmatprep.subr.mxu0 %v334_v0 }
  0x27   :  { %206 = vmatpush3.msra.mxu0 %v55_v6 }
  0x28   :  { %207 = vmatprep.subr.mxu0 %v334_v0 }
  0x29   :  { %208 = vmatpush3.msra.mxu0 %v54_v7 }
  0x2a   :  { %209 = vmatprep.subr.mxu0 %v334_v0 }
  0x2b   :  { %210 = vmatpush3.msra.mxu0 %v53_v8 }
  0x2c   :  { %211 = vmatprep.subr.mxu0 %v334_v0 }
  0x2d   :  { %212 = vmatpush3.msra.mxu0 %v52_v9 }
  0x2e   :  { %213 = vmatprep.subr.mxu0 %v334_v0 }
  0x2f   :  { %214 = vmatpush3.msra.mxu0 %v51_v10 }
  0x30   :  { %215 = vmatprep.subr.mxu0 %v334_v0 }
  0x31   :  { %216 = vmatpush3.msra.mxu0 %v50_v11 }
  0x32   :  { %217 = vmatprep.subr.mxu0 %v334_v0 }
  0x33   :  { %218 = vmatpush3.msra.mxu0 %v49_v12 }
  0x34   :  { %219 = vmatprep.subr.mxu0 %v334_v0 }
  0x35   :  { %220 = vmatpush3.msra.mxu0 %v48_v13 }
  0x36   :  { %221 = vmatprep.subr.mxu0 %v334_v0 }
  0x37   :  { %222 = vmatpush3.msra.mxu0 %v47_v14 }
  0x38   :  { %223 = vmatprep.subr.mxu0 %v334_v0 }
  0x39   :  { %224 = vmatpush3.msra.mxu0 %v46_v15 }
  0x3a   :  { %225 = vmatprep.subr.mxu0 %v334_v0 }
  0x3b   :  { %226 = vmatpush3.msra.mxu0 %v45_v16 }
  0x3c   :  { %228 = vmatmul.mubr.f32.vlgmr.msra.gmra.mxu0 %v44_v17 }
  0xfc   :  { %v134_v19 = vpop.f32.mrf.mxu0 }
  0xfd   :  { %v135_v20 = vadd.f32 %v176_v18, %v134_v19 }
  0xfe   :  { %v229_v21 = vpop.f32.mrf.mxu0 }
  0xff   :  { %v177_v22 = vmul.f32 -1.442695, %v135_v20  ;;  %138 = vst [vmem:[#allocation7] sm:$0xff] %v135_v20 }
 0x100   :  { %293 = shalt.err (!%p290_p0)
}
 0x101   :  { %155 = dma.vmem_to_hbm [thread:$0]  %s153_s28, 128, %s381_s3, [#allocation4]   ;;  %238 = vpow2.f32 %v177_v22 }
 0x102   :  { %s337_s2 = smov [#allocation8]  }
 0x103   :  { %s162_s6 = sshll.u32 %s337_s2, 4  ;;  %s163_s6 = int_to_ptr.vmem [resolvable:$true] %s162_s6 }
 0x104   :  { %s302_s7 = scalar_lea.vmem %s163_s6, 128  ;;  %p307_p2 = scmp.lt.s32.totalorder %s163_s6, %s163_s6 }
 0x105   :  { %p303_p1 = scmp.ne.s32.totalorder %s163_s6, %s302_s7  ;;  %p308_p3 = scmp.lt.s32.totalorder %s302_s7, %s302_s7 }
 0x107   :  { %p309_p4 = por %p308_p3, %p307_p2 }
 0x109   :  { %p310_p5 = pnand %p309_p4, %p303_p1 }
 0x10e   :  { %v239_v23 = vpop.eup %238 }
 0x10f   :  { %v142_v24 = vadd.f32 1.0, %v239_v23 }
 0x111   :  { %240 = vrcp.f32 %v142_v24 }
 0x11e   :  { %v241_v25 = vpop.eup %240 }
 0x11f   :  { %145 = vst [vmem:[#allocation8] sm:$0xff] %v241_v25 }
 0x120   :  { %313 = shalt.err (!%p310_p5)
}
 0x121   :  { %165 = dma.vmem_to_hbm [thread:$0]  %s163_s6, 128, %s382_s4, [#allocation9]  }
 0x122   :  { %326 = dma.done.wait [#allocation4], 128  }
 0x123   :  { %327 = vsyncadd [#allocation4], 4294967168 }
 0x124   :  { %328 = dma.done.wait [#allocation9], 128  }
 0x125   :  { %329 = vsyncadd [#allocation9], 4294967168 }
 0x126   :  { %172 = vsyncpa [#allocation3], 1 }
 0x127   :  { %173 = vsyncpa [#allocation6], 1 }
 0x128   :  { %174 = vsyncpa [#allocation4], 1 }
 0x129   :  { %175 = vsyncpa [#allocation9], 1 }

</bundles_post_ra>
